<compile_context>
chip_gen: v7x
topology: tpu7x:2x2x1
jax: 0.10.0
libtpu: 0.0.40
codegen_flags: <defaults>
</compile_context>

<pallas_src>
import math

import jax
import jax.numpy as jnp
from jax.experimental import pallas as pl
from jax.experimental.pallas import tpu as pltpu


def _round_up(x, m):
    return ((x + m - 1) // m) * m


def cl_matmul_kernel(x_ref, w_ref, b_ref, o_ref, acc_ref):
    """One (tm, tn) tile of  y = x @ W + b, accumulated over the K grid axis."""
    k = pl.program_id(2)

    @pl.when(k == 0)
    def _init():
        # Fold the bias into the f32 accumulator once (hoisted broadcast);
        # no per-step `y + b`.
        acc_ref[...] = jnp.broadcast_to(b_ref[...], acc_ref.shape)

    # bf16 operands, f32 accumulation on the MXU.
    acc_ref[...] += jnp.dot(x_ref[...], w_ref[...],
                            preferred_element_type=jnp.float32)

    @pl.when(k == pl.num_programs(2) - 1)
    def _finalize():
        o_ref[...] = acc_ref[...].astype(o_ref.dtype)


def cl_forward(x, w, b, *, compute_dtype=jnp.bfloat16):
    """Eval-mode CL forward:  y = Dropout(x) @ W^T + b  (Dropout == identity).

    x: (B, F) float; w: (C, F) (torch nn.Linear layout); b: (C,).
    Returns (B, C) in x.dtype.
    """
    B, F = x.shape
    C = w.shape[0]
    out_dtype = x.dtype

    # ---- pad to lane-dense / MXU-friendly sizes -----------------------------
    C_pad = _round_up(C, 128)
    F_pad = _round_up(F, 128)

    # Tile sizes: 2*(tm*tk + tk*tn)*2B (double-buffered bf16 inputs) +
    # tm*tn*4B (f32 acc) stays well under the default scoped-VMEM limit on
    # v5e/v6e/v7x, so no vmem_limit override is required.
    tm = min(256, _round_up(B, 8))
    tn = 256 if C_pad % 256 == 0 else 128
    tk = 512 if F_pad % 512 == 0 else (256 if F_pad % 256 == 0 else 128)
    B_pad = _round_up(B, tm)

    # Zero-pad operands; zero K columns contribute nothing to the dot.
    x_p = jnp.zeros((B_pad, F_pad), compute_dtype).at[:B, :F].set(
        x.astype(compute_dtype))
    w_t = jnp.zeros((F_pad, C_pad), compute_dtype).at[:F, :C].set(
        w.T.astype(compute_dtype))
    b_p = jnp.zeros((1, C_pad), jnp.float32).at[0, :C].set(
        b.astype(jnp.float32))

    grid = (B_pad // tm, C_pad // tn, F_pad // tk)

    cost = pl.CostEstimate(
        flops=2 * B_pad * F_pad * C_pad,
        transcendentals=0,
        bytes_accessed=(x_p.size * x_p.dtype.itemsize
                        + w_t.size * w_t.dtype.itemsize
                        + b_p.size * b_p.dtype.itemsize
                        + B_pad * C_pad * jnp.dtype(out_dtype).itemsize),
    )

    y_pad = pl.pallas_call(
        cl_matmul_kernel,
        out_shape=jax.ShapeDtypeStruct((B_pad, C_pad), out_dtype),
        grid_spec=pltpu.PrefetchScalarGridSpec(
            num_scalar_prefetch=0,
            grid=grid,
            in_specs=[
                pl.BlockSpec((tm, tk), lambda i, j, k: (i, k)),   # x tile
                pl.BlockSpec((tk, tn), lambda i, j, k: (k, j)),   # W tile
                pl.BlockSpec((1, tn), lambda i, j, k: (0, j)),    # bias tile
            ],
            out_specs=pl.BlockSpec((tm, tn), lambda i, j, k: (i, j)),
            scratch_shapes=[pltpu.VMEM((tm, tn), jnp.float32)],
        ),
        compiler_params=pltpu.CompilerParams(
            dimension_semantics=("parallel", "parallel", "arbitrary")),
        cost_estimate=cost,
    )(x_p, w_t, b_p)

    # Slice off padded rows and padded class columns (padded logits must never
    # reach a downstream softmax/argmax).
    return y_pad[:B, :C]


def cl_forward_auto(x, w, b):
    """Dispatch: plain XLA matmul for toy sizes, Pallas kernel for big ones."""
    B, F = x.shape
    C = w.shape[0]
    if 2 * B * F * C < (1 << 22):
        # Per-call / per-grid-step overhead dwarfs the work at tiny sizes.
        return (x @ w.T.astype(x.dtype) + b.astype(x.dtype))
    return cl_forward(x, w, b)


def init_cl_params(key, end_feat, num_classes):
    """Deterministic init mirroring nn.Linear's default (uniform +-1/sqrt(fan_in))."""
    k_w, k_b = jax.random.split(key)
    bound = 1.0 / math.sqrt(end_feat)
    # torch stores weight as (num_classes, end_feat); keep that layout here.
    w = jax.random.uniform(k_w, (num_classes, end_feat),
                           minval=-bound, maxval=bound, dtype=jnp.float32)
    b = jax.random.uniform(k_b, (num_classes,),
                           minval=-bound, maxval=bound, dtype=jnp.float32)
    return w, b


if __name__ == "__main__":
    end_feat = 384      # pads to F_pad=384 -> K grid of 3 (exercises accumulation)
    num_classes = 20    # pads to C_pad=128 -> lane-dense output stores
    batch = 64
    dropout = 0.5       # identity at inference

    key = jax.random.PRNGKey(0)
    k_x, k_p = jax.random.split(key)

    x = jax.random.normal(k_x, (batch, end_feat), dtype=jnp.float32)
    w, b = init_cl_params(k_p, end_feat, num_classes)

    y = cl_forward(x, w, b)             # Pallas kernel path
    y = jax.block_until_ready(y)

    # Reference with the same bf16 operand cast (f32 accumulate, f32 bias).
    y_ref_bf16 = jnp.dot(x.astype(jnp.bfloat16), w.T.astype(jnp.bfloat16),
                         preferred_element_type=jnp.float32) + b
    # Pure-f32 reference (loose tolerance: bf16 operand rounding).
    y_ref_f32 = x @ w.T + b

    assert y.shape == (batch, num_classes)
    assert jnp.allclose(y, y_ref_bf16, atol=2e-3, rtol=1e-3)
    assert jnp.allclose(y, y_ref_f32, atol=5e-2, rtol=0.0)

    print("KERNEL_OK")
</pallas_src>

<mosaic_0001>
module attributes {stable_mosaic.version = 11 : i64} {
  func.func @cl_matmul_kernel(%arg0: i32, %arg1: i32, %arg2: i32, %arg3: memref<64x128xbf16, #tpu.memory_space<vmem>>, %arg4: memref<128x128xbf16, #tpu.memory_space<vmem>>, %arg5: memref<1x128xf32, #tpu.memory_space<vmem>>, %arg6: memref<64x128xf32, #tpu.memory_space<vmem>>, %arg7: memref<64x128xf32, #tpu.memory_space<vmem>>) attributes {dimension_semantics = [#tpu.dimension_semantics<parallel>, #tpu.dimension_semantics<parallel>, #tpu.dimension_semantics<arbitrary>], iteration_bounds = array<i64: 1, 1, 3>, scalar_prefetch = 0 : i64, scratch_operands = 1 : i64, tpu.core_type = #tpu.core_type<tc>, window_params = [{transform_indices = @transform_0, window_bounds = array<i64: 64, 128>}, {transform_indices = @transform_1, window_bounds = array<i64: 128, 128>}, {transform_indices = @transform_2, window_bounds = array<i64: 1, 128>}, {transform_indices = @transform_3, window_bounds = array<i64: 64, 128>}]} {
    %c0_i32 = arith.constant 0 : i32
    %0 = arith.cmpi eq, %arg2, %c0_i32 : i32
    %1 = arith.extui %0 : i1 to i32
    %c0_i32_0 = arith.constant 0 : i32
    %2 = arith.cmpi ne, %1, %c0_i32_0 : i32
    scf.if %2 {
      %c0_9 = arith.constant 0 : index
      %c0_10 = arith.constant 0 : index
      %12 = vector.load %arg5[%c0_9, %c0_10] : memref<1x128xf32, #tpu.memory_space<vmem>>, vector<1x128xf32>
      %13 = vector.shape_cast %12 : vector<1x128xf32> to vector<1x128xf32>
      %14 = vector.broadcast %13 : vector<1x128xf32> to vector<64x128xf32>
      %c0_11 = arith.constant 0 : index
      %c0_12 = arith.constant 0 : index
      %15 = vector.load %arg7[%c0_11, %c0_12] : memref<64x128xf32, #tpu.memory_space<vmem>>, vector<64x128xf32>
      tpu.vector_store %arg7[%c0_11, %c0_12], %14 {strides = array<i32>} : memref<64x128xf32, #tpu.memory_space<vmem>>, vector<64x128xf32>,
    } else {
    }
    %c0 = arith.constant 0 : index
    %c0_1 = arith.constant 0 : index
    %3 = vector.load %arg7[%c0, %c0_1] : memref<64x128xf32, #tpu.memory_space<vmem>>, vector<64x128xf32>
    %c0_2 = arith.constant 0 : index
    %c0_3 = arith.constant 0 : index
    %4 = vector.load %arg3[%c0_2, %c0_3] : memref<64x128xbf16, #tpu.memory_space<vmem>>, vector<64x128xbf16>
    %c0_4 = arith.constant 0 : index
    %c0_5 = arith.constant 0 : index
    %5 = vector.load %arg4[%c0_4, %c0_5] : memref<128x128xbf16, #tpu.memory_space<vmem>>, vector<128x128xbf16>
    %cst = arith.constant dense<0.000000e+00> : vector<64x128xf32>
    %6 = tpu.matmul %4, %5, %cst {dimension_numbers = #tpu.dot_dimension_numbers<[1], [0], [0], [1], [0, 0, 1, 1], [], []>} : vector<64x128xbf16>, vector<128x128xbf16>, vector<64x128xf32> -> vector<64x128xf32>
    %7 = arith.addf %3, %6 : vector<64x128xf32>
    %c0_6 = arith.constant 0 : index
    %c0_7 = arith.constant 0 : index
    %8 = vector.load %arg7[%c0_6, %c0_7] : memref<64x128xf32, #tpu.memory_space<vmem>>, vector<64x128xf32>
    tpu.vector_store %arg7[%c0_6, %c0_7], %7 {strides = array<i32>} : memref<64x128xf32, #tpu.memory_space<vmem>>, vector<64x128xf32>,
    %c2_i32 = arith.constant 2 : i32
    %9 = arith.cmpi eq, %arg2, %c2_i32 : i32
    %10 = arith.extui %9 : i1 to i32
    %c0_i32_8 = arith.constant 0 : i32
    %11 = arith.cmpi ne, %10, %c0_i32_8 : i32
    scf.if %11 {
      %c0_9 = arith.constant 0 : index
      %c0_10 = arith.constant 0 : index
      %12 = vector.load %arg7[%c0_9, %c0_10] : memref<64x128xf32, #tpu.memory_space<vmem>>, vector<64x128xf32>
      %c0_11 = arith.constant 0 : index
      %c0_12 = arith.constant 0 : index
      %13 = vector.load %arg6[%c0_11, %c0_12] : memref<64x128xf32, #tpu.memory_space<vmem>>, vector<64x128xf32>
      tpu.vector_store %arg6[%c0_11, %c0_12], %12 {strides = array<i32>} : memref<64x128xf32, #tpu.memory_space<vmem>>, vector<64x128xf32>,
    } else {
    }
    return
  }
  func.func @transform_0(%arg0: i32, %arg1: i32, %arg2: i32) -> (i32, i32) {
    %c0_i32 = arith.constant 0 : i32
    return %arg0, %arg2 : i32, i32
  }
  func.func @transform_1(%arg0: i32, %arg1: i32, %arg2: i32) -> (i32, i32) {
    %c0_i32 = arith.constant 0 : i32
    return %arg2, %arg1 : i32, i32
  }
  func.func @transform_2(%arg0: i32, %arg1: i32, %arg2: i32) -> (i32, i32) {
    %c0_i32 = arith.constant 0 : i32
    %c0_i32_0 = arith.constant 0 : i32
    return %c0_i32, %arg1 : i32, i32
  }
  func.func @transform_3(%arg0: i32, %arg1: i32, %arg2: i32) -> (i32, i32) {
    %c0_i32 = arith.constant 0 : i32
    return %arg0, %arg1 : i32, i32
  }
}

</mosaic_0001>

<bundles_post_ra>
// kernel: tpu_custom_call.1
= control target key start
LH: loop header
LB: loop body
LE: loop exit
PB: predicated region body
PF: predicated region fallthrough
CT: control target
= control target key end

     0   :  { %8 = vsyncpa [#allocation4], 0  ;;  %s1177_s0 = inlined_call_operand.hbm [shape: bf16[64,384], index: 0, kind: input, shape index: {}]   ;;  %s1178_s1 = inlined_call_operand.hbm [shape: bf16[384,128], index: 1, kind: input, shape index: {}]   ;;  %s1179_s2 = inlined_call_operand.vmem [shape: f32[1,128], index: 2, kind: input, shape index: {}]   ;;  %s1180_s3 = inlined_call_operand.hbm [shape: f32[64,128], index: 3, kind: output, shape index: {}]  }
   0x1   :  { %10 = vsyncpa [#allocation4 + $0x1], 0 }
   0x2   :  { %11 = vsyncpa [#allocation7], 0 }
   0x3   :  { %13 = vsyncpa [#allocation7 + $0x1], 0 }
   0x4   :  { %14 = vsyncpa [#allocation5], 0  ;;  %s952_s12 = smov 0   ;;  %s954_s13 = smov 0  }
   0x5   :  { %s956_s14 = smov 0   ;;  %s958_s15 = smov 0  }
   0x6   :  { %s960_s16 = smov 0   ;;  %s962_s17 = smov 0  }
   0x7 LB: > { %s610_s18 = sadd.s32 4294967295, %s922_s17   ;;  %s32_s19 = sadd.s32 1, %s918_s16  ;;  %s922_s17 = sphi %s962_s17, %s20_s17   ;;  %s918_s16 = sphi %s960_s16, %s1193_s16   ;;  %s914_s15 = sphi %s958_s15, %s1192_s15   ;;  %s910_s14 = sphi %s956_s14, %s1191_s14   ;;  %s906_s13 = sphi %s954_s13, %s1190_s13   ;;  %s902_s12 = sphi %s952_s12, %s1189_s12  }
   0x8   : > { %p33_p0 = scmp.ge.s32.totalorder %s32_s19, 3  ;;  %s48_s20 = sadd.s32 1, %s910_s14 }
   0x9   : > { %p55_p1 = scmp.ne.s32.totalorder %s910_s14, %s906_s13  ;;  %p56_p2 = scmp.eq.s32.totalorder %s922_s17, 0 }
   0xa   : > { %s1195_s19 = smov (%p33_p0, %s32_s19), 0  ;;  %p61_p4 = scmp.ne.s32.totalorder %s906_s13, %s902_s12 }
   0xb   : > { %p988_p3 = por %p56_p2, %p55_p1  ;;  %s44_s22 = ssub.s32 %s918_s16, %s1195_s19 }
   0xc   : > { %p62_p5 = scmp.eq.s32.totalorder %s610_s18, 0  ;;  %p46_p6 = scmp.eq.s32.totalorder %s44_s22, 0 }
   0xd   : > { %p709_p8 = scmp.lt.s32.totalorder %s922_s17, 3  ;;  %s1006_s25 = sand.u32 1, %s910_s14  }
   0xe   : > { %p997_p7 = por %p62_p5, %p61_p4  ;;  %s615_s26 = sshll.u32 %s918_s16, 6 }
   0xf   : > { %s1003_s24 = scalar_select %p46_p6, %s910_s14, %s48_s20  }
  0x10   : > { %s1183_s23 = scalar_select %p997_p7, 1, 0 }
  0x11   : > { %s614_s27 = sshll.u32 %s1006_s25, 5  ;;  %s1013_s30 = scalar_lea.hbm %s1177_s0, %s615_s26 }
  0x12   : > { %s177_s4 = scalar_lea.vmem [#allocation3], %s614_s27  ;;  %p1017_p9 = pnand %p709_p8, %p988_p3 }
  0x13   : > { %s186_s5 = sshll.u32 %s177_s4, 4  ;;  %s174_s7 = scalar_lea.sflag [#allocation4], %s1006_s25  ;;  %s1021_s5 = int_to_ptr.vmem [resolvable:$true] %s186_s5 }
  0x14   : > { %s778_s8 = scalar_lea.hbm %s1013_s30, 512  ;;  %p780_p12 = pneg %p1017_p9 }
  0x15   : > { %p779_p11 = scmp.ne.s32.totalorder %s1013_s30, %s778_s8  ;;  %s783_s11 = scalar_lea.hbm %s1177_s0, 1536 }
  0x16   : > { %p784_p1 = scmp.lt.u32.totalorder %s1013_s30, %s1177_s0  ;;  %p785_p2 = scmp.lt.u32.totalorder %s783_s11, %s778_s8 }
  0x17   : > { %p781_p13 = pnand %p780_p12, %p779_p11  ;;  %p787_p4 = scmp.lt.u32.totalorder %s778_s8, %s1013_s30 }
  0x18   : > { %p786_p3 = por %p785_p2, %p784_p1 }
  0x19   : > { %p782_p0 = pneg %p781_p13 }
  0x1a   : > { %p788_p5 = por %p787_p4, %p786_p3 }
  0x1c   : > { %p789_p6 = pnand %p788_p5, %p782_p0 }
  0x1e   : > { %792 = shalt.err (!%p789_p6)
}
  0x1f   : > { %s793_s21 = scalar_lea.vmem %s1021_s5, 512  ;;  %s924_s22 = smov [#allocation3]  }
  0x20   : > { %p794_p8 = scmp.ne.s32.totalorder %s1021_s5, %s793_s21  ;;  %s798_s26 = sshll.u32 %s924_s22, 4  ;;  %s799_s26 = int_to_ptr.vmem [resolvable:$false] %s798_s26 }
  0x21   : > { %s800_s27 = scalar_lea.vmem %s799_s26, 1024  ;;  %p801_p10 = scmp.lt.s32.totalorder %s1021_s5, %s799_s26 }
  0x22   : > { %p796_p11 = pnand %p794_p8, %p780_p12  ;;  %p802_p1 = scmp.lt.s32.totalorder %s800_s27, %s793_s21 }
  0x24   : > { %p797_p13 = pneg %p796_p11  ;;  %p803_p2 = por %p802_p1, %p801_p10 }
  0x26   : > { %p804_p3 = pnand %p803_p2, %p797_p13 }
  0x28   : > { %807 = shalt.err (!%p804_p3)
}
  0x29   : > { %s925_s28 = smov 192   ;;  %s926_s29 = smov 64  }
  0x2a   : > { %s927_s4 = smov 4   ;;  %p216_p10 = scmp.lt.s32.totalorder %s922_s17, 4 }
  0x2b   : > { %705 = dma.hbm_to_vmem [thread:$0]  (!%p1017_p9), %s1013_s30, 512, %s1021_s5, %s174_s7, %s925_s28, %s926_s29, %s927_s4  }
  0x2c   : > { %s616_s8 = sshll.u32 %s1006_s25, 6  ;;  %s641_s9 = sshll.u32 %s918_s16, 10 }
  0x2d   : > { %p1185_p0 = scmp.ge.s32.totalorder %s922_s17, 1  ;;  %s1066_s20 = scalar_lea.hbm %s1178_s1, %s641_s9 }
  0x2e   : > { %s200_s21 = scalar_lea.vmem [#allocation6], %s616_s8  ;;  %s197_s30 = scalar_lea.sflag [#allocation7], %s1006_s25 }
  0x2f   : > { %p1059_p4 = pnand %p1185_p0, %p216_p10  ;;  %s208_s22 = sshll.u32 %s200_s21, 4  ;;  %s1068_s22 = int_to_ptr.vmem [resolvable:$true] %s208_s22 }
  0x30   : > { %s808_s5 = scalar_lea.hbm %s1066_s20, 1024  ;;  %s813_s27 = scalar_lea.hbm %s1178_s1, 3072 }
  0x31   : > { %p809_p5 = scmp.ne.s32.totalorder %s1066_s20, %s808_s5  ;;  %p814_p11 = scmp.lt.u32.totalorder %s1066_s20, %s1178_s1 }
  0x32   : > { %p815_p13 = scmp.lt.u32.totalorder %s813_s27, %s808_s5  ;;  %p817_p2 = scmp.lt.u32.totalorder %s808_s5, %s1066_s20 }
  0x33   : > { %p811_p6 = pnand %p809_p5, %p780_p12 }
  0x34   : > { %p816_p1 = por %p815_p13, %p814_p11 }
  0x35   : > { %p812_p8 = pneg %p811_p6 }
  0x36   : > { %p818_p3 = por %p817_p2, %p816_p1 }
  0x38   : > { %p819_p10 = pnand %p818_p3, %p812_p8 }
  0x3a   : > { %822 = shalt.err (!%p819_p10)
}
  0x3b   : > { %s823_s8 = scalar_lea.vmem %s1068_s22, 1024  ;;  %s928_s11 = smov [#allocation6]  }
  0x3c   : > { %p824_p0 = scmp.ne.s32.totalorder %s1068_s22, %s823_s8  ;;  %s828_s12 = sshll.u32 %s928_s11, 4  ;;  %s829_s12 = int_to_ptr.vmem [resolvable:$false] %s828_s12 }
  0x3d   : > { %s830_s21 = scalar_lea.vmem %s829_s12, 2048  ;;  %p831_p7 = scmp.lt.s32.totalorder %s1068_s22, %s829_s12 }
  0x3e   : > { %p826_p5 = pnand %p824_p0, %p780_p12  ;;  %p832_p11 = scmp.lt.s32.totalorder %s830_s21, %s823_s8 }
  0x40   : > { %p827_p6 = pneg %p826_p5  ;;  %p833_p13 = por %p832_p11, %p831_p7 }
  0x42   : > { %p834_p1 = pnand %p833_p13, %p827_p6 }
  0x44   : > { %837 = shalt.err (!%p834_p1)
}
  0x45   : > { %708 = dma.hbm_to_vmem [thread:$0]  (!%p1017_p9), %s1066_s20, 1024, %s1068_s22, %s197_s30, %s926_s29, %s926_s29, %s927_s4  }
  0x46   : > { %220 = sbr.rel (%p1059_p4) target bundleno = 376 (0x178), region = 32  ;;  %s222_s5 = sand.u32 (!%p1059_p4), 1, %s906_s13  }
  0x47   : > { %s620_s7 = sshll.u32 (!%p1059_p4), %s222_s5, 5  ;;  %s223_s26 = scalar_lea.sflag (!%p1059_p4), [#allocation4], %s222_s5 }
  0x48   : > { %s1102_s27 = scalar_lea.vmem (!%p1059_p4), [#allocation3], %s620_s7  ;;  %p1187_p7 = scmp.ne.s32.totalorder (!%p1059_p4), %s1183_s23, 0 }
  0x4d   : > { %889 = dma.done.wait (%p1187_p7), %s223_s26, 512  }
  0x4e   : > { %891 = vsyncadd (%p1187_p7), %s223_s26, 4294966784  ;;  %s621_s25 = sshll.u32 %s222_s5, 6  ;;  %s232_s6 = scalar_lea.sflag [#allocation7], %s222_s5 }
  0x4f   : > { %s1108_s28 = scalar_lea.vmem [#allocation6], %s621_s25 }
  0x50   : > { %893 = dma.done.wait (%p1187_p7), %s232_s6, 1024  }
  0x51   : > { %895 = vsyncadd (%p1187_p7), %s232_s6, 4294966272  ;;  %p622_p9 = scmp.ne.s32.totalorder %s914_s15, 0 }
  0x52   : > { %v623_v0 = vld [vmem:[%s1179_s2] ss:$0 sm:$0xff] (!%p622_p9) }
  0x53   : > { %271 = sbr.rel (%p622_p9) target bundleno = 90 (0x5a), region = 44  ;;  %279 = vst [vmem:[#allocation2] sm:$0xff] (!%p622_p9), %v623_v0  ;;  %280 = vst [vmem:[#allocation2 + $0x8] sm:$0xff] (!%p622_p9), %v623_v0 }
  0x54   : > { %281 = vst [vmem:[#allocation2 + $0x10] sm:$0xff] (!%p622_p9), %v623_v0  ;;  %282 = vst [vmem:[#allocation2 + $0x18] sm:$0xff] (!%p622_p9), %v623_v0 }
  0x55   : > { %283 = vst [vmem:[#allocation2 + $0x20] sm:$0xff] (!%p622_p9), %v623_v0  ;;  %284 = vst [vmem:[#allocation2 + $0x28] sm:$0xff] (!%p622_p9), %v623_v0 }
  0x56   : > { %285 = vst [vmem:[#allocation2 + $0x30] sm:$0xff] (!%p622_p9), %v623_v0  ;;  %286 = vst [vmem:[#allocation2 + $0x38] sm:$0xff] (!%p622_p9), %v623_v0 }
  0x5a PF: > { %v766_v1 = vld [vmem:[%s1108_s28] sm:$0xff]   ;;  %v767_v2 = vld [vmem:[%s1108_s28 + $0x8] sm:$0xff]   ;;  %v768_v3 = vld [vmem:[%s1108_s28 + $0x10] sm:$0xff]   ;;  %p636_p12 = scmp.ne.s32.totalorder %s914_s15, 2 }
  0x5b   : > { %654 = vmatprep.subr.bf16.mxu0 %v766_v1  ;;  %678 = vmatprep.subr.bf16.mxu1 %v766_v1  ;;  %v769_v4 = vld [vmem:[%s1108_s28 + $0x18] sm:$0xff]   ;;  %v774_v5 = vld [vmem:[%s1102_s27] sm:$0xff]   ;;  %v775_v6 = vld [vmem:[%s1102_s27 + $0x10] sm:$0xff]  }
  0x5c   : > { %655 = vmatpush3.bf16.msra.mxu0 %v766_v1  ;;  %686 = vmatpush3.bf16.msra.mxu1 %v766_v1  ;;  %v770_v7 = vld [vmem:[%s1108_s28 + $0x20] sm:$0xff]   ;;  %v771_v8 = vld [vmem:[%s1108_s28 + $0x28] sm:$0xff]   ;;  %v772_v9 = vld [vmem:[%s1108_s28 + $0x30] sm:$0xff]  }
  0x5d   : > { %656 = vmatprep.subr.bf16.mxu0 %v767_v2  ;;  %679 = vmatprep.subr.bf16.mxu1 %v767_v2  ;;  %v773_v10 = vld [vmem:[%s1108_s28 + $0x38] sm:$0xff]   ;;  %v776_v11 = vld [vmem:[%s1102_s27 + $0x8] sm:$0xff]   ;;  %v289_v13 = vld [vmem:[#allocation2 + $0x10] sm:$0xff] }
  0x5e   : > { %670 = vmatprep.mubr.bf16.mxu0 %v774_v5  ;;  %674 = vmatprep.mubr.bf16.mxu1 %v775_v6  ;;  %v777_v12 = vld [vmem:[%s1102_s27 + $0x18] sm:$0xff]   ;;  %v293_v14 = vld [vmem:[#allocation2 + $0x30] sm:$0xff]  ;;  %v287_v15 = vld [vmem:[#allocation2] sm:$0xff] }
  0x5f   : > { %v291_v16 = vld [vmem:[#allocation2 + $0x20] sm:$0xff]  ;;  %v290_v19 = vld [vmem:[#allocation2 + $0x18] sm:$0xff]  ;;  %v288_v25 = vld [vmem:[#allocation2 + $0x8] sm:$0xff] }
  0x60   : > { %657 = vmatpush3.bf16.msra.mxu0 %v767_v2  ;;  %687 = vmatpush3.bf16.msra.mxu1 %v767_v2  ;;  %v294_v20 = vld [vmem:[#allocation2 + $0x38] sm:$0xff]  ;;  %v292_v26 = vld [vmem:[#allocation2 + $0x28] sm:$0xff] }
  0x61   : > { %658 = vmatprep.subr.bf16.mxu0 %v768_v3  ;;  %680 = vmatprep.subr.bf16.mxu1 %v768_v3 }
  0x64   : > { %659 = vmatpush3.bf16.msra.mxu0 %v768_v3  ;;  %688 = vmatpush3.bf16.msra.mxu1 %v768_v3 }
  0x65   : > { %660 = vmatprep.subr.bf16.mxu0 %v769_v4  ;;  %681 = vmatprep.subr.bf16.mxu1 %v769_v4 }
  0x68   : > { %661 = vmatpush3.bf16.msra.mxu0 %v769_v4  ;;  %689 = vmatpush3.bf16.msra.mxu1 %v769_v4 }
  0x69   : > { %662 = vmatprep.subr.bf16.mxu0 %v770_v7  ;;  %682 = vmatprep.subr.bf16.mxu1 %v770_v7 }
  0x6c   : > { %663 = vmatpush3.bf16.msra.mxu0 %v770_v7  ;;  %690 = vmatpush3.bf16.msra.mxu1 %v770_v7 }
  0x6d   : > { %664 = vmatprep.subr.bf16.mxu0 %v771_v8  ;;  %683 = vmatprep.subr.bf16.mxu1 %v771_v8 }
  0x70   : > { %665 = vmatpush3.bf16.msra.mxu0 %v771_v8  ;;  %691 = vmatpush3.bf16.msra.mxu1 %v771_v8 }
  0x71   : > { %666 = vmatprep.subr.bf16.mxu0 %v772_v9  ;;  %684 = vmatprep.subr.bf16.mxu1 %v772_v9 }
  0x74   : > { %667 = vmatpush3.bf16.msra.mxu0 %v772_v9  ;;  %692 = vmatpush3.bf16.msra.mxu1 %v772_v9 }
  0x75   : > { %668 = vmatprep.subr.bf16.mxu0 %v773_v10  ;;  %685 = vmatprep.subr.bf16.mxu1 %v773_v10 }
  0x78   : > { %669 = vmatpush3.bf16.msra.mxu0 %v773_v10  ;;  %693 = vmatpush3.bf16.msra.mxu1 %v773_v10 }
  0x7b   : > { %671 = vmatmul.mubr.bf16.vlgmr.msra.gmra.mrb[0].mxu0 %v776_v11  ;;  %675 = vmatmul.mubr.bf16.vlgmr.msra.gmra.mrb[0].mxu1 %v777_v12 }
 0x14e   : > { %v672_v17 = vpop.f32.mrb[0].mxu0  ;;  %v676_v18 = vpop.f32.mrb[0].mxu1  ;;  %475 = sbr.rel (%p636_p12) target bundleno = 350 (0x15e), region = 48 }
 0x14f   : > { %v458_v21 = vadd.f32 %v672_v17, %v289_v13  ;;  %v462_v22 = vadd.f32 %v676_v18, %v293_v14  ;;  %v425_v23 = vpop.f32.mrb[1].mxu0  ;;  %v441_v24 = vpop.f32.mrb[1].mxu1 }
 0x150   : > { %v456_v27 = vadd.f32 %v425_v23, %v287_v15  ;;  %v460_v28 = vadd.f32 %v441_v24, %v291_v16  ;;  %v673_v29 = vpop.f32.mrb[2].mxu0  ;;  %v677_v30 = vpop.f32.mrb[2].mxu1 }
 0x151   : > { %466 = vst [vmem:[#allocation2 + $0x10] sm:$0xff] %v458_v21  ;;  %470 = vst [vmem:[#allocation2 + $0x30] sm:$0xff] %v462_v22  ;;  %v459_v31 = vadd.f32 %v673_v29, %v290_v19  ;;  %v463_v32 = vadd.f32 %v677_v30, %v294_v20  ;;  %v428_v33 = vpop.f32.mrb[3].mxu0  ;;  %v444_v34 = vpop.f32.mrb[3].mxu1 }
 0x152   : > { %464 = vst [vmem:[#allocation2] sm:$0xff] %v456_v27  ;;  %468 = vst [vmem:[#allocation2 + $0x20] sm:$0xff] %v460_v28  ;;  %v457_v35 = vadd.f32 %v428_v33, %v288_v25  ;;  %v461_v36 = vadd.f32 %v444_v34, %v292_v26 }
 0x153   : > { %467 = vst [vmem:[#allocation2 + $0x18] sm:$0xff] %v459_v31  ;;  %471 = vst [vmem:[#allocation2 + $0x38] sm:$0xff] %v463_v32 }
 0x154   : > { %465 = vst [vmem:[#allocation2 + $0x8] sm:$0xff] %v457_v35  ;;  %469 = vst [vmem:[#allocation2 + $0x28] sm:$0xff] %v461_v36 }
 0x158   : > { %v478_v39 = vld [vmem:[#allocation2 + $0x10] sm:$0xff] }
 0x159   : > { %v476_v37 = vld [vmem:[#allocation2] sm:$0xff]  ;;  %486 = vst [vmem:[#allocation8 + $0x10] sm:$0xff] %v478_v39  ;;  %v482_v43 = vld [vmem:[#allocation2 + $0x30] sm:$0xff] }
 0x15a   : > { %484 = vst [vmem:[#allocation8] sm:$0xff] %v476_v37  ;;  %v479_v40 = vld [vmem:[#allocation2 + $0x18] sm:$0xff]  ;;  %v480_v41 = vld [vmem:[#allocation2 + $0x20] sm:$0xff]  ;;  %490 = vst [vmem:[#allocation8 + $0x30] sm:$0xff] %v482_v43 }
 0x15b   : > { %v477_v38 = vld [vmem:[#allocation2 + $0x8] sm:$0xff]  ;;  %487 = vst [vmem:[#allocation8 + $0x18] sm:$0xff] %v479_v40  ;;  %488 = vst [vmem:[#allocation8 + $0x20] sm:$0xff] %v480_v41  ;;  %v483_v44 = vld [vmem:[#allocation2 + $0x38] sm:$0xff] }
 0x15c   : > { %485 = vst [vmem:[#allocation8 + $0x8] sm:$0xff] %v477_v38  ;;  %v481_v42 = vld [vmem:[#allocation2 + $0x28] sm:$0xff]  ;;  %491 = vst [vmem:[#allocation8 + $0x38] sm:$0xff] %v483_v44 }
 0x15d   : > { %489 = vst [vmem:[#allocation8 + $0x28] sm:$0xff] %v481_v42 }
 0x15e PF: > { %p1133_p4 = scmp.eq.s32.totalorder %s610_s18, 2  ;;  %s929_s23 = smov [#allocation8]  }
 0x15f   : > { %s502_s10 = sshll.u32 %s929_s23, 4  ;;  %s503_s10 = int_to_ptr.vmem [resolvable:$true] %s502_s10 }
 0x160   : > { %s838_s20 = scalar_lea.vmem %s503_s10, 1024  ;;  %p845_p10 = scmp.lt.s32.totalorder %s503_s10, %s503_s10 }
 0x161   : > { %p839_p8 = scmp.ne.s32.totalorder %s503_s10, %s838_s20  ;;  %p846_p0 = scmp.lt.s32.totalorder %s838_s20, %s838_s20 }
 0x163   : > { %p840_p2 = pnand %p839_p8, %p1133_p4  ;;  %p847_p5 = por %p846_p0, %p845_p10 }
 0x165   : > { %p841_p3 = pneg %p840_p2 }
 0x167   : > { %p848_p6 = pnand %p847_p5, %p841_p3 }
 0x169   : > { %851 = shalt.err (!%p848_p6)
}
 0x16a   : > { %s852_s18 = scalar_lea.hbm %s1180_s3, 1024 }
 0x16b   : > { %p853_p11 = scmp.ne.s32.totalorder %s1180_s3, %s852_s18  ;;  %p858_p7 = scmp.lt.u32.totalorder %s852_s18, %s1180_s3 }
 0x16d   : > { %p854_p13 = pnand %p853_p11, %p1133_p4 }
 0x16f   : > { %p855_p1 = pneg %p854_p13 }
 0x171   : > { %p860_p9 = pnand %p858_p7, %p855_p1 }
 0x173   : > { %863 = shalt.err (!%p860_p9)
}
 0x174   : > { %s930_s21 = smov 128   ;;  %s931_s5 = smov 8  }
 0x175   : > { %699 = dma.vmem_to_hbm [thread:$0]  (%p1133_p4), %s503_s10, 1024, %s1180_s3, [#allocation5], %s930_s21, %s930_s21, %s931_s5  }
 0x176   : > { %897 = dma.done.wait (%p1133_p4), [#allocation5], 1024  }
 0x177   : > { %899 = vsyncadd (%p1133_p4), [#allocation5], 4294966272 }
 0x178 PF: > { %s20_s17 = sadd.s32 1, %s922_s17   ;;  %s1189_s12 = smov %s906_s13 }
 0x179   : > { %p17_p12 = scmp.ge.s32.totalorder %s20_s17, 5   ;;  %s1190_s13 = smov %s910_s14 }
 0x17a   : > { %s1191_s14 = smov %s1003_s24  ;;  %s1192_s15 = smov %s918_s16 }
 0x17b   : > { %s1193_s16 = smov %s1195_s19  ;;  %19 = sbr.rel (!%p17_p12) target bundleno = 7 (0x7), region = 94 }
 0x182   :  { %518 = vsyncpa [#allocation4], 1 }
 0x183   :  { %520 = vsyncpa [#allocation4 + $0x1], 1 }
 0x184   :  { %521 = vsyncpa [#allocation7], 1 }
 0x185   :  { %523 = vsyncpa [#allocation7 + $0x1], 1 }
 0x186   :  { %524 = vsyncpa [#allocation5], 1 }
 0x187   :  { %526 = vsyncpa [#allocation5 + $0x1], 1 }

</bundles_post_ra>
